<compile_context>
chip_gen: v7x
topology: tpu7x:2x2x1
jax: 0.10.0
libtpu: 0.0.40
codegen_flags: <defaults>
</compile_context>

<pallas_src>
import functools

import jax
import jax.numpy as jnp
from jax import lax
from jax.experimental import pallas as pl
from jax.experimental.pallas import tpu as pltpu


def _make_pam_kernel(mxu_dtype, approx_recip):
    """Builds the per-(batch, query-tile) kernel body."""

    def kernel(alpha_ref,                                        # SMEM (1,)
               x_ref, w1_ref, w2_ref, w3_ref, b1_ref, b2_ref, b3_ref,
               out_ref, cf_ref, df_ref):
        # x_ref        : (1, Cp, N)   full key range for this batch element
        # out_ref      : (1, Cp, TQ)  one query tile of the output
        # cf_ref/df_ref: (Cp, N)      VMEM scratch, recomputed when batch changes
        tq = out_ref.shape[-1]
        q = pl.program_id(1)
        q0 = pl.multiple_of(q * tq, tq)
        alpha = alpha_ref[0]

        # Key / value projections: compute once per batch element and keep
        # them resident in VMEM scratch across all query tiles of this batch.
        @pl.when(q == 0)
        def _():
            xm = x_ref[0].astype(mxu_dtype)                          # (Cp, N)
            cf = jnp.dot(w2_ref[...].astype(mxu_dtype), xm,
                         preferred_element_type=jnp.float32) + b2_ref[...]
            df = jnp.dot(w3_ref[...].astype(mxu_dtype), xm,
                         preferred_element_type=jnp.float32) + b3_ref[...]
            cf_ref[...] = cf.astype(cf_ref.dtype)
            df_ref[...] = df.astype(df_ref.dtype)

        x_q = x_ref[0, :, pl.ds(q0, tq)]                             # (Cp, TQ) f32
        bf_q = jnp.dot(w1_ref[...].astype(mxu_dtype), x_q.astype(mxu_dtype),
                       preferred_element_type=jnp.float32) + b1_ref[...]

        # S[q, k] = <bf[:, q], cf[:, k]> : contract channels directly
        # (MXU-native transposed contraction, no XLU transpose / VMEM copy).
        s = lax.dot_general(
            bf_q.astype(mxu_dtype), cf_ref[...],
            dimension_numbers=(((0,), (0,)), ((), ())),
            preferred_element_type=jnp.float32)                      # (TQ, N)

        # Softmax over keys, all in f32 on the VPU/EUP.
        m = jnp.max(s, axis=-1, keepdims=True)
        p = jnp.exp(s - m)
        denom = jnp.sum(p, axis=-1, keepdims=True)
        attn = p * pl.reciprocal(denom, approx=approx_recip)         # (TQ, N)

        # E[:, q] = sum_k df[:, k] * attn[q, k]   (== D @ S^T, contract keys).
        e = lax.dot_general(
            df_ref[...], attn.astype(mxu_dtype),
            dimension_numbers=(((1,), (1,)), ((), ())),
            preferred_element_type=jnp.float32)                      # (Cp, TQ)

        out_ref[0] = (x_q + alpha * e).astype(out_ref.dtype)

    return kernel


def _pad_axis(a, axis, target):
    pad = target - a.shape[axis]
    if pad == 0:
        return a
    widths = [(0, 0)] * a.ndim
    widths[axis] = (0, pad)
    return jnp.pad(a, widths)


@functools.partial(jax.jit, static_argnames=("mxu_dtype", "tq"))
def position_attention_module(x_nchw, w1, b1, w2, b2, w3, b3, alpha,
                              *, mxu_dtype=jnp.bfloat16, tq=None):
    """x_nchw: (B, C, H, W) f32. w*: (C, C) torch-style (out, in). b*: (C,)."""
    bsz, ch, h, w = x_nchw.shape
    n = h * w

    # Lane / sublane friendly sizes.
    c_pad = max(8, ((ch + 7) // 8) * 8)
    if tq is None:
        tq = 128 if n % 128 == 0 else n          # query tile (multiple of 128)
    assert n % tq == 0

    # NCHW-native: only free reshapes + zero-padding, no transposes.
    x_p = _pad_axis(x_nchw.reshape(bsz, ch, n), 1, c_pad)            # (B, Cp, N)

    def pad_w(wk):
        return _pad_axis(_pad_axis(wk, 0, c_pad), 1, c_pad)          # (Cp, Cp)

    def pad_b(bk):
        return _pad_axis(bk, 0, c_pad).reshape(c_pad, 1)             # (Cp, 1)

    w1_p, w2_p, w3_p = pad_w(w1), pad_w(w2), pad_w(w3)
    b1_p, b2_p, b3_p = pad_b(b1), pad_b(b2), pad_b(b3)
    alpha_r = jnp.asarray(alpha, jnp.float32).reshape(1)

    approx_recip = (mxu_dtype != jnp.float32)
    kernel = _make_pam_kernel(mxu_dtype, approx_recip)

    grid = (bsz, n // tq)
    out_p = pl.pallas_call(
        kernel,
        out_shape=jax.ShapeDtypeStruct((bsz, c_pad, n), x_p.dtype),
        grid_spec=pltpu.PrefetchScalarGridSpec(
            num_scalar_prefetch=1,                 # alpha -> SMEM
            grid=grid,
            in_specs=[
                # x: full key range per batch element; block index is constant
                # along the query axis so it is not re-DMA'd per query tile.
                pl.BlockSpec((1, c_pad, n), lambda b, q, a: (b, 0, 0)),
                pl.BlockSpec((c_pad, c_pad), lambda b, q, a: (0, 0)),   # W1
                pl.BlockSpec((c_pad, c_pad), lambda b, q, a: (0, 0)),   # W2
                pl.BlockSpec((c_pad, c_pad), lambda b, q, a: (0, 0)),   # W3
                pl.BlockSpec((c_pad, 1), lambda b, q, a: (0, 0)),       # b1
                pl.BlockSpec((c_pad, 1), lambda b, q, a: (0, 0)),       # b2
                pl.BlockSpec((c_pad, 1), lambda b, q, a: (0, 0)),       # b3
            ],
            # Lane-dense output: last dim is a multiple of 128 -> unmasked vst.
            out_specs=pl.BlockSpec((1, c_pad, tq), lambda b, q, a: (b, 0, q)),
            scratch_shapes=[
                pltpu.VMEM((c_pad, n), mxu_dtype),   # Cf (key projections)
                pltpu.VMEM((c_pad, n), mxu_dtype),   # Df (value projections)
            ],
        ),
        compiler_params=pltpu.CompilerParams(
            # Batch axis megacore-parallel; query axis carries Cf/Df scratch.
            dimension_semantics=("parallel", "arbitrary"),
            # Explicit budget with headroom for v7x's 64 MiB VMEM.
            vmem_limit_bytes=48 * 1024 * 1024),
    )(alpha_r, x_p, w1_p, w2_p, w3_p, b1_p, b2_p, b3_p)

    # Drop channel padding; reshape back to NCHW (free).
    return out_p[:, :ch, :].reshape(bsz, ch, h, w)


def _reference(x, w1, b1, w2, b2, w3, b3, alpha):
    """Pure-JAX mirror of the PyTorch forward (NCHW, f32)."""
    bsz, ch, h, w = x.shape
    n = h * w
    xf = x.reshape(bsz, ch, n)                                       # (B, C, N)

    def conv1x1(wk, bk):
        return jnp.einsum('oc,bcn->bon', wk, xf) + bk[None, :, None]

    Bf = jnp.transpose(conv1x1(w1, b1), (0, 2, 1))                   # (B, N, C)
    Cf = conv1x1(w2, b2)                                             # (B, C, N)
    Df = conv1x1(w3, b3)                                             # (B, C, N)
    S = jax.nn.softmax(jnp.einsum('bnc,bcm->bnm', Bf, Cf), axis=-1)  # (B, N, N)
    E = jnp.einsum('bcn,bmn->bcm', Df, S)                            # (B, C, N)
    return x + alpha * E.reshape(bsz, ch, h, w)


if __name__ == "__main__":
    key = jax.random.PRNGKey(0)
    batch, channels, height, width = 2, 4, 16, 16

    k_x, k1, k2, k3, kb1, kb2, kb3 = jax.random.split(key, 7)
    x = jax.random.normal(k_x, (batch, channels, height, width), jnp.float32)

    # Deterministic synthetic parameters (Conv2d 1x1 weights -> (C_out, C_in)).
    scale = 1.0 / jnp.sqrt(channels)
    w1 = jax.random.normal(k1, (channels, channels), jnp.float32) * scale
    w2 = jax.random.normal(k2, (channels, channels), jnp.float32) * scale
    w3 = jax.random.normal(k3, (channels, channels), jnp.float32) * scale
    b1 = jax.random.normal(kb1, (channels,), jnp.float32) * 0.1
    b2 = jax.random.normal(kb2, (channels,), jnp.float32) * 0.1
    b3 = jax.random.normal(kb3, (channels,), jnp.float32) * 0.1
    # nn.Parameter(torch.zeros(1)) would make the attention branch vanish;
    # use a nonzero deterministic alpha so the kernel path is exercised.
    alpha = jnp.float32(0.5)

    ref = _reference(x, w1, b1, w2, b2, w3, b3, alpha)

    # 1) Exactness check: full-f32 MXU path must match the reference tightly.
    out_f32 = position_attention_module(x, w1, b1, w2, b2, w3, b3, alpha,
                                        mxu_dtype=jnp.float32)
    out_f32 = jax.block_until_ready(out_f32)
    assert out_f32.shape == (batch, channels, height, width)
    assert jnp.allclose(out_f32, ref, atol=1e-4, rtol=1e-4), "f32 mismatch vs reference"

    # 2) Fast path: bf16 MXU operands (f32 accumulation / f32 softmax).
    out_bf16 = position_attention_module(x, w1, b1, w2, b2, w3, b3, alpha,
                                         mxu_dtype=jnp.bfloat16)
    out_bf16 = jax.block_until_ready(out_bf16)
    assert out_bf16.shape == (batch, channels, height, width)
    assert jnp.allclose(out_bf16, ref, atol=1e-1, rtol=1e-1), "bf16 mismatch vs reference"

    print("KERNEL_OK")
</pallas_src>

<mosaic_0001>
module attributes {stable_mosaic.version = 11 : i64} {
  func.func @kernel(%arg0: i32, %arg1: i32, %arg2: memref<1xf32, #tpu.memory_space<smem>>, %arg3: memref<1x8x256xf32, #tpu.memory_space<vmem>>, %arg4: memref<8x8xf32, #tpu.memory_space<vmem>>, %arg5: memref<8x8xf32, #tpu.memory_space<vmem>>, %arg6: memref<8x8xf32, #tpu.memory_space<vmem>>, %arg7: memref<8x1xf32, #tpu.memory_space<vmem>>, %arg8: memref<8x1xf32, #tpu.memory_space<vmem>>, %arg9: memref<8x1xf32, #tpu.memory_space<vmem>>, %arg10: memref<1x8x128xf32, #tpu.memory_space<vmem>>, %arg11: memref<8x256xf32, #tpu.memory_space<vmem>>, %arg12: memref<8x256xf32, #tpu.memory_space<vmem>>) attributes {dimension_semantics = [#tpu.dimension_semantics<parallel>, #tpu.dimension_semantics<arbitrary>], iteration_bounds = array<i64: 2, 2>, scalar_prefetch = 1 : i64, scratch_operands = 2 : i64, tpu.core_type = #tpu.core_type<tc>, window_params = [{transform_indices = @transform_0, window_bounds = array<i64: 1, 8, 256>}, {pipeline_mode = #tpu.pipeline_mode<synchronous>, transform_indices = @transform_1, window_bounds = array<i64: 8, 8>}, {pipeline_mode = #tpu.pipeline_mode<synchronous>, transform_indices = @transform_2, window_bounds = array<i64: 8, 8>}, {pipeline_mode = #tpu.pipeline_mode<synchronous>, transform_indices = @transform_3, window_bounds = array<i64: 8, 8>}, {pipeline_mode = #tpu.pipeline_mode<synchronous>, transform_indices = @transform_4, window_bounds = array<i64: 8, 1>}, {pipeline_mode = #tpu.pipeline_mode<synchronous>, transform_indices = @transform_5, window_bounds = array<i64: 8, 1>}, {pipeline_mode = #tpu.pipeline_mode<synchronous>, transform_indices = @transform_6, window_bounds = array<i64: 8, 1>}, {transform_indices = @transform_7, window_bounds = array<i64: 1, 8, 128>}]} {
    %c128_i32 = arith.constant 128 : i32
    %0 = arith.muli %arg1, %c128_i32 : i32
    %1 = tpu.assume_multiple %0, 128 : i32
    %c0 = arith.constant 0 : index
    %2 = memref.load %arg2[%c0] : memref<1xf32, #tpu.memory_space<smem>>
    %c0_i32 = arith.constant 0 : i32
    %3 = arith.cmpi eq, %arg1, %c0_i32 : i32
    %4 = arith.extui %3 : i1 to i32
    %c0_i32_0 = arith.constant 0 : i32
    %5 = arith.cmpi ne, %4, %c0_i32_0 : i32
    scf.if %5 {
      %c0_18 = arith.constant 0 : index
      %c0_19 = arith.constant 0 : index
      %c0_20 = arith.constant 0 : index
      %34 = vector.load %arg3[%c0_18, %c0_19, %c0_20] : memref<1x8x256xf32, #tpu.memory_space<vmem>>, vector<1x8x256xf32>
      %35 = vector.shape_cast %34 : vector<1x8x256xf32> to vector<8x256xf32>
      %c0_21 = arith.constant 0 : index
      %c0_22 = arith.constant 0 : index
      %36 = vector.load %arg5[%c0_21, %c0_22] : memref<8x8xf32, #tpu.memory_space<vmem>>, vector<8x8xf32>
      %cst_23 = arith.constant dense<0.000000e+00> : vector<8x256xf32>
      %37 = tpu.matmul %36, %35, %cst_23 {dimension_numbers = #tpu.dot_dimension_numbers<[1], [0], [0], [1], [0, 0, 1, 1], [], []>} : vector<8x8xf32>, vector<8x256xf32>, vector<8x256xf32> -> vector<8x256xf32>
      %c0_24 = arith.constant 0 : index
      %c0_25 = arith.constant 0 : index
      %38 = vector.load %arg8[%c0_24, %c0_25] : memref<8x1xf32, #tpu.memory_space<vmem>>, vector<8x1xf32>
      %39 = vector.broadcast %38 : vector<8x1xf32> to vector<8x256xf32>
      %40 = arith.addf %37, %39 : vector<8x256xf32>
      %c0_26 = arith.constant 0 : index
      %c0_27 = arith.constant 0 : index
      %41 = vector.load %arg6[%c0_26, %c0_27] : memref<8x8xf32, #tpu.memory_space<vmem>>, vector<8x8xf32>
      %cst_28 = arith.constant dense<0.000000e+00> : vector<8x256xf32>
      %42 = tpu.matmul %41, %35, %cst_28 {dimension_numbers = #tpu.dot_dimension_numbers<[1], [0], [0], [1], [0, 0, 1, 1], [], []>} : vector<8x8xf32>, vector<8x256xf32>, vector<8x256xf32> -> vector<8x256xf32>
      %c0_29 = arith.constant 0 : index
      %c0_30 = arith.constant 0 : index
      %43 = vector.load %arg9[%c0_29, %c0_30] : memref<8x1xf32, #tpu.memory_space<vmem>>, vector<8x1xf32>
      %44 = vector.broadcast %43 : vector<8x1xf32> to vector<8x256xf32>
      %45 = arith.addf %42, %44 : vector<8x256xf32>
      %c0_31 = arith.constant 0 : index
      %c0_32 = arith.constant 0 : index
      %46 = vector.load %arg11[%c0_31, %c0_32] : memref<8x256xf32, #tpu.memory_space<vmem>>, vector<8x256xf32>
      tpu.vector_store %arg11[%c0_31, %c0_32], %40 {strides = array<i32>} : memref<8x256xf32, #tpu.memory_space<vmem>>, vector<8x256xf32>,
      %c0_33 = arith.constant 0 : index
      %c0_34 = arith.constant 0 : index
      %47 = vector.load %arg12[%c0_33, %c0_34] : memref<8x256xf32, #tpu.memory_space<vmem>>, vector<8x256xf32>
      tpu.vector_store %arg12[%c0_33, %c0_34], %45 {strides = array<i32>} : memref<8x256xf32, #tpu.memory_space<vmem>>, vector<8x256xf32>,
    } else {
    }
    %c0_1 = arith.constant 0 : index
    %c0_2 = arith.constant 0 : index
    %6 = arith.index_cast %1 : i32 to index
    %7 = vector.load %arg3[%c0_1, %c0_2, %6] : memref<1x8x256xf32, #tpu.memory_space<vmem>>, vector<1x8x128xf32>
    %8 = vector.shape_cast %7 : vector<1x8x128xf32> to vector<8x128xf32>
    %c0_3 = arith.constant 0 : index
    %c0_4 = arith.constant 0 : index
    %9 = vector.load %arg4[%c0_3, %c0_4] : memref<8x8xf32, #tpu.memory_space<vmem>>, vector<8x8xf32>
    %cst = arith.constant dense<0.000000e+00> : vector<8x128xf32>
    %10 = tpu.matmul %9, %8, %cst {dimension_numbers = #tpu.dot_dimension_numbers<[1], [0], [0], [1], [0, 0, 1, 1], [], []>} : vector<8x8xf32>, vector<8x128xf32>, vector<8x128xf32> -> vector<8x128xf32>
    %c0_5 = arith.constant 0 : index
    %c0_6 = arith.constant 0 : index
    %11 = vector.load %arg7[%c0_5, %c0_6] : memref<8x1xf32, #tpu.memory_space<vmem>>, vector<8x1xf32>
    %12 = vector.broadcast %11 : vector<8x1xf32> to vector<8x128xf32>
    %13 = arith.addf %10, %12 : vector<8x128xf32>
    %c0_7 = arith.constant 0 : index
    %c0_8 = arith.constant 0 : index
    %14 = vector.load %arg11[%c0_7, %c0_8] : memref<8x256xf32, #tpu.memory_space<vmem>>, vector<8x256xf32>
    %cst_9 = arith.constant dense<0.000000e+00> : vector<128x256xf32>
    %15 = tpu.matmul %13, %14, %cst_9 {dimension_numbers = #tpu.dot_dimension_numbers<[0], [0], [1], [1], [0, 1, 1, 1], [], []>} : vector<8x128xf32>, vector<8x256xf32>, vector<128x256xf32> -> vector<128x256xf32>
    %cst_10 = arith.constant dense<0xFF800000> : vector<128xf32>
    %16 = vector.multi_reduction <maximumf>, %15, %cst_10 [1] : vector<128x256xf32> to vector<128xf32>
    %17 = vector.shape_cast %16 : vector<128xf32> to vector<128x1xf32>
    %18 = vector.broadcast %17 : vector<128x1xf32> to vector<128x256xf32>
    %19 = arith.subf %15, %18 : vector<128x256xf32>
    %20 = math.exp %19 : vector<128x256xf32>
    %cst_11 = arith.constant dense<0.000000e+00> : vector<128xf32>
    %21 = vector.multi_reduction <add>, %20, %cst_11 [1] : vector<128x256xf32> to vector<128xf32>
    %22 = vector.shape_cast %21 : vector<128xf32> to vector<128x1xf32>
    %23 = tpu.reciprocal %22 : vector<128x1xf32> -> vector<128x1xf32>
    %24 = vector.broadcast %23 : vector<128x1xf32> to vector<128x256xf32>
    %25 = arith.mulf %20, %24 : vector<128x256xf32>
    %c0_12 = arith.constant 0 : index
    %c0_13 = arith.constant 0 : index
    %26 = vector.load %arg12[%c0_12, %c0_13] : memref<8x256xf32, #tpu.memory_space<vmem>>, vector<8x256xf32>
    %cst_14 = arith.constant dense<0.000000e+00> : vector<8x128xf32>
    %27 = tpu.matmul %26, %25, %cst_14 {dimension_numbers = #tpu.dot_dimension_numbers<[1], [1], [0], [0], [0, 0, 1, 0], [], []>} : vector<8x256xf32>, vector<128x256xf32>, vector<8x128xf32> -> vector<8x128xf32>
    %28 = vector.broadcast %2 : f32 to vector<8x128xf32>
    %29 = arith.mulf %28, %27 : vector<8x128xf32>
    %30 = arith.addf %8, %29 : vector<8x128xf32>
    %c0_15 = arith.constant 0 : index
    %c0_16 = arith.constant 0 : index
    %c0_17 = arith.constant 0 : index
    %31 = vector.load %arg10[%c0_15, %c0_16, %c0_17] : memref<1x8x128xf32, #tpu.memory_space<vmem>>, vector<1x8x128xf32>
    %32 = vector.shape_cast %31 : vector<1x8x128xf32> to vector<8x128xf32>
    %33 = vector.shape_cast %30 : vector<8x128xf32> to vector<1x8x128xf32>
    tpu.vector_store %arg10[%c0_15, %c0_16, %c0_17], %33 {strides = array<i32>} : memref<1x8x128xf32, #tpu.memory_space<vmem>>, vector<1x8x128xf32>,
    return
  }
  func.func @transform_0(%arg0: i32, %arg1: i32, %arg2: memref<1xf32, #tpu.memory_space<smem>>) -> (i32, i32, i32) {
    %c0_i32 = arith.constant 0 : i32
    %c0_i32_0 = arith.constant 0 : i32
    %c0_i32_1 = arith.constant 0 : i32
    return %arg0, %c0_i32, %c0_i32_0 : i32, i32, i32
  }
  func.func @transform_1(%arg0: i32, %arg1: i32, %arg2: memref<1xf32, #tpu.memory_space<smem>>) -> (i32, i32) {
    %c0_i32 = arith.constant 0 : i32
    %c0_i32_0 = arith.constant 0 : i32
    %c0_i32_1 = arith.constant 0 : i32
    return %c0_i32, %c0_i32_0 : i32, i32
  }
  func.func @transform_2(%arg0: i32, %arg1: i32, %arg2: memref<1xf32, #tpu.memory_space<smem>>) -> (i32, i32) {
    %c0_i32 = arith.constant 0 : i32
    %c0_i32_0 = arith.constant 0 : i32
    %c0_i32_1 = arith.constant 0 : i32
    return %c0_i32, %c0_i32_0 : i32, i32
  }
  func.func @transform_3(%arg0: i32, %arg1: i32, %arg2: memref<1xf32, #tpu.memory_space<smem>>) -> (i32, i32) {
    %c0_i32 = arith.constant 0 : i32
    %c0_i32_0 = arith.constant 0 : i32
    %c0_i32_1 = arith.constant 0 : i32
    return %c0_i32, %c0_i32_0 : i32, i32
  }
  func.func @transform_4(%arg0: i32, %arg1: i32, %arg2: memref<1xf32, #tpu.memory_space<smem>>) -> (i32, i32) {
    %c0_i32 = arith.constant 0 : i32
    %c0_i32_0 = arith.constant 0 : i32
    %c0_i32_1 = arith.constant 0 : i32
    return %c0_i32, %c0_i32_0 : i32, i32
  }
  func.func @transform_5(%arg0: i32, %arg1: i32, %arg2: memref<1xf32, #tpu.memory_space<smem>>) -> (i32, i32) {
    %c0_i32 = arith.constant 0 : i32
    %c0_i32_0 = arith.constant 0 : i32
    %c0_i32_1 = arith.constant 0 : i32
    return %c0_i32, %c0_i32_0 : i32, i32
  }
  func.func @transform_6(%arg0: i32, %arg1: i32, %arg2: memref<1xf32, #tpu.memory_space<smem>>) -> (i32, i32) {
    %c0_i32 = arith.constant 0 : i32
    %c0_i32_0 = arith.constant 0 : i32
    %c0_i32_1 = arith.constant 0 : i32
    return %c0_i32, %c0_i32_0 : i32, i32
  }
  func.func @transform_7(%arg0: i32, %arg1: i32, %arg2: memref<1xf32, #tpu.memory_space<smem>>) -> (i32, i32, i32) {
    %c0_i32 = arith.constant 0 : i32
    %c0_i32_0 = arith.constant 0 : i32
    return %arg0, %c0_i32, %arg1 : i32, i32, i32
  }
}

</mosaic_0001>

<bundles_post_ra>
// kernel: position_attention_module.1
= control target key start
LH: loop header
LB: loop body
LE: loop exit
PB: predicated region body
PF: predicated region fallthrough
CT: control target
= control target key end

     0   :  { %s1512_s29 = smov 0   ;;  %s1514_s30 = smov 0   ;;  %s1895_s0 = inlined_call_operand.<no memory space> [shape: f32[1], index: 0, kind: input, shape index: {}]   ;;  %s1896_s1 = inlined_call_operand.vmem [shape: f32[2,8,256], index: 1, kind: input, shape index: {}]   ;;  %s1897_s2 = inlined_call_operand.vmem [shape: f32[8,8], index: 2, kind: input, shape index: {}]   ;;  %s1898_s3 = inlined_call_operand.vmem [shape: f32[8,8], index: 3, kind: input, shape index: {}]   ;;  %s1899_s4 = inlined_call_operand.vmem [shape: f32[8,8], index: 4, kind: input, shape index: {}]   ;;  %s1900_s5 = inlined_call_operand.vmem [shape: f32[8,1], index: 5, kind: input, shape index: {}]   ;;  %s1901_s6 = inlined_call_operand.vmem [shape: f32[8,1], index: 6, kind: input, shape index: {}]   ;;  %s1902_s7 = inlined_call_operand.vmem [shape: f32[8,1], index: 7, kind: input, shape index: {}]   ;;  %s1903_s8 = inlined_call_operand.vmem [shape: f32[2,8,256], index: 8, kind: output, shape index: {}]  }
   0x1   :  { %13 = sst [smem:[#allocation5]] %s1895_s0  ;;  %s1516_s9 = smov 0  }
   0x2   :  { %s1518_s10 = smov 0   ;;  %s1520_s11 = smov 0  }
   0x3 LB: > { %s28_s0 = sadd.s32 1, %s1449_s9  ;;  %s31_s12 = sadd.s32 1, %s1453_s10  ;;  %s1457_s11 = sphi %s1520_s11, %s19_s11   ;;  %s1453_s10 = sphi %s1518_s10, %s1907_s10   ;;  %s1449_s9 = sphi %s1516_s9, %s1906_s9   ;;  %s1445_s30 = sphi %s1514_s30, %s1905_s30   ;;  %s1441_s29 = sphi %s1512_s29, %s1904_s29  }
   0x4   : > { %p29_p0 = scmp.ge.s32.totalorder %s28_s0, 2  ;;  %p1207_p1 = scmp.ge.s32.totalorder %s1457_s11, 1 }
   0x5   : > { %p253_p2 = scmp.lt.s32.totalorder %s1457_s11, 5 }
   0x6   : > { %s1909_s0 = smov (%p29_p0, %s28_s0), 0  ;;  %s1911_s12 = smov (!%p29_p0, %s31_s12), %s1453_s10 }
   0x7   : > { %p254_p3 = pnand %p1207_p1, %p253_p2  ;;  %p33_p4 = scmp.ge.s32.totalorder %s1911_s12, 2 }
   0x8   : > { %p288_p5 = scmp.lt.s32.totalorder (!%p254_p3), %s1445_s30, 1  ;;  %p295_p6 = scmp.lt.s32.totalorder (!%p254_p3), %s1441_s29, 1 }
   0x9   : > { %s1913_s12 = smov (%p33_p4, %s1911_s12), 0  ;;  %257 = sbr.rel (%p254_p3) target bundleno = 1404 (0x57c), region = 48 }
   0xa   : > { %s1212_s13 = sshll.u32 (!%p254_p3), %s1441_s29, 7  ;;  %s1546_s14 = sld [smem:[#allocation5]] (!%p254_p3) }
   0xb   : > { %p1213_p7 = scmp.ne.s32.totalorder (!%p254_p3), %s1441_s29, 0 }
  0x10   : > { %s1915_s30 = smov (!%p288_p5, %s1445_s30), 1  ;;  %306 = sbr.rel (%p1213_p7) target bundleno = 239 (0xef), region = 52 }
  0x11   : > { %s296_s15 = scalar_select %p295_p6, %s1441_s29, 1 }
  0x12   : > { %s1236_s16 = sshll.u32 %s1915_s30, 4  ;;  %s1210_s17 = sshll.u32 %s1915_s30, 1  ;;  %v309_v2 = vld [vmem:[%s1898_s3] sm:$0xff] (!%p1213_p7)  ;;  %vm316_vm0 = vcmask (!%p1213_p7), 64512   ;;  %v1459_v4 = vmov (!%p1213_p7), 0.0   ;;  %v1460_v6 = vmov (!%p1213_p7), 0  }
  0x13   : > { %s1552_s20 = scalar_lea.vmem %s1896_s1, %s1236_s16  ;;  %s298_s21 = sadd.s32 %s1210_s17, %s296_s15  ;;  %v391_v3 = vld [vmem:[%s1899_s4] sm:$0xff] (!%p1213_p7)  ;;  %384 = vmatprep.mubr.f32.mxu0 (!%p1213_p7), %v1459_v4  ;;  %465 = vmatprep.mubr.f32.mxu1 (!%p1213_p7), %v1459_v4 }
  0x14   : > { %s1211_s22 = sshll.u32 %s298_s21, 3  ;;  %v308_v0 = vld [vmem:[%s1552_s20 + $0x8] sm:$0xff] (!%p1213_p7)  ;;  %v307_v1 = vld [vmem:[%s1552_s20] sm:$0xff] (!%p1213_p7)  ;;  %1321 = vset.pattern.permute.xlu0 (!%p1213_p7), %v1460_v6 }
  0x15   : > { %s1557_s25 = scalar_lea.vmem %s1903_s8, %s1211_s22  ;;  %320 = vmatprep.subr.mxu0 (!%p1213_p7), %v308_v0  ;;  %401 = vmatprep.subr.mxu1 (!%p1213_p7), %v308_v0  ;;  %v310_v5 = vld [vmem:[%s1901_s6] sm:$0xff] (!%p1213_p7) }
  0x16   : > { %321 = vmatpush1.msra.mxu0 (!%p1213_p7), %v307_v1  ;;  %402 = vmatpush1.msra.mxu1 (!%p1213_p7), %v307_v1  ;;  %v392_v7 = vld [vmem:[%s1902_s7] sm:$0xff] (!%p1213_p7) }
  0x17   : > { %1214 = vmatmul.mubr.msk.f32.vlgmr.msra.gmra.mrb[0].mxu0 %vm316_vm0, %v309_v2  ;;  %1215 = vmatmul.mubr.msk.f32.vlgmr.msra.gmra.mrb[0].mxu1 %vm316_vm0, %v391_v3 }
  0x18   : > { %313 = vperm.xlu0 %1321, %v310_v5  }
  0x1c   : > { %395 = vperm.xlu0 %1321, %v392_v7  }
  0x97   : > { %v314_v8 = vpop.permute.xlu0 %313 }
  0x9b   : > { %v396_v9 = vpop.permute.xlu0 %395 }
  0xea   : > { %v386_v10 = vpop.f32.mrb[0].mxu0  ;;  %v467_v11 = vpop.f32.mrb[0].mxu1 }
  0xeb   : > { %v387_v12 = vadd.f32 %v386_v10, %v314_v8  ;;  %v468_v13 = vadd.f32 %v467_v11, %v396_v9  ;;  %v388_v14 = vpop.f32.mrb[1].mxu0  ;;  %v469_v15 = vpop.f32.mrb[1].mxu1 }
  0xec   : > { %v389_v16 = vadd.f32 %v388_v14, %v314_v8  ;;  %v470_v17 = vadd.f32 %v469_v15, %v396_v9 }
  0xed   : > { %472 = vst [vmem:[#allocation2] sm:$0xff] %v387_v12  ;;  %474 = vst [vmem:[#allocation3] sm:$0xff] %v468_v13 }
  0xee   : > { %473 = vst [vmem:[#allocation2 + $0x8] sm:$0xff] %v389_v16  ;;  %475 = vst [vmem:[#allocation3 + $0x8] sm:$0xff] %v470_v17 }
  0xef PF: > { %s476_s19 = sshra.s32 %s1212_s13, 7  ;;  %v1461_v18 = vmov 0.0   ;;  %vm1462_vm1 = vmmov 0   ;;  %v482_v19 = vld [vmem:[%s1900_s5] sm:$0xff]  ;;  %vm488_vm2 = vcmask 64512   ;;  %v1463_v21 = vmov 0  }
  0xf0   : > { %1239 = vmatprep.subr.mxu0 %v1461_v18  ;;  %s1216_s21 = sshll.u32 %s476_s19, 3  ;;  %1241 = vmatprep.mubr.msk.f32.mxu0 %vm1462_vm1, %v1461_v18  ;;  %v481_v20 = vld [vmem:[%s1897_s2] sm:$0xff] }
  0xf1   : > { %s479_s24 = scalar_lea.vmem %s1552_s20, %s1216_s21  ;;  %1322 = vset.pattern.permute.xlu0 %v1463_v21  ;;  %708 = vmatprep.mubr.f32.mxu1 %v1461_v18 }
  0xf2   : > { %v1586_v22 = vld [vmem:[%s479_s24] sm:$0xff]  ;;  %485 = vperm.xlu0 %1322, %v482_v19  }
  0xf3   : > { %1240 = vmatpush3.msra.mxu0 %v1586_v22 }
  0xf4   : > { %1242 = vmatmul.mubr.msk.f32.vlgmr.msra.gmra.mrb[0].mxu0 %vm488_vm2, %v481_v20  ;;  %v562_v24 = vld [vmem:[#allocation2] sm:$0xff] }
  0xf5   : > { %v563_v23 = vld [vmem:[#allocation2 + $0x8] sm:$0xff] }
  0xf6   : > { %644 = vmatprep.subr.mxu1 %v563_v23 }
  0xf7   : > { %645 = vmatpush1.msra.mxu1 %v562_v24 }
 0x171   : > { %v486_v25 = vpop.permute.xlu0 %485 }
 0x1c7   : > { %v558_v26 = vpop.f32.mrb[0].mxu0 }
 0x1c8   : > { %v559_v27 = vadd.f32 %v558_v26, %v486_v25  ;;  %v1243_v28 = vpop.f32.mrb[1].mxu0 }
 0x1ca   : > { %564 = vxpose.xlu0.b32.start.end [1/1] (short) %v559_v27, 128 }
 0x24a   : > { %v580_v29 = vpop.trf.xlu0 }
 0x24b   : > { %1218 = vmatmul.mubr.msk.f32.vlgmr.msra.gmra.mrb[0].mxu1 %vm488_vm2, %v580_v29 }
 0x24c   : > { %714 = vmatprep.mubr.f32.mxu1 %v1461_v18 }
 0x24e   : > { %v581_v30 = vpop.trf.xlu0 }
 0x24f   : > { %1219 = vmatmul.mubr.msk.f32.gmra.mrb[2].mxu1 %vm488_vm2, %v581_v30 }
 0x250   : > { %720 = vmatprep.mubr.f32.mxu1 %v1461_v18 }
 0x252   : > { %v582_v31 = vpop.trf.xlu0 }
 0x253   : > { %1220 = vmatmul.mubr.msk.f32.gmra.mrb[4].mxu1 %vm488_vm2, %v582_v31 }
 0x254   : > { %726 = vmatprep.mubr.f32.mxu1 %v1461_v18 }
 0x256   : > { %v583_v32 = vpop.trf.xlu0 }
 0x257   : > { %1221 = vmatmul.mubr.msk.f32.gmra.mrb[6].mxu1 %vm488_vm2, %v583_v32 }
 0x258   : > { %732 = vmatprep.mubr.f32.mxu1 %v1461_v18 }
 0x25a   : > { %v584_v33 = vpop.trf.xlu0 }
 0x25b   : > { %1222 = vmatmul.mubr.msk.f32.gmra.mrb[8].mxu1 %vm488_vm2, %v584_v33 }
 0x25c   : > { %738 = vmatprep.mubr.f32.mxu1 %v1461_v18 }
 0x25e   : > { %v585_v34 = vpop.trf.xlu0 }
 0x25f   : > { %1223 = vmatmul.mubr.msk.f32.gmra.mrb[10].mxu1 %vm488_vm2, %v585_v34 }
 0x260   : > { %744 = vmatprep.mubr.f32.mxu1 %v1461_v18 }
 0x262   : > { %v586_v35 = vpop.trf.xlu0 }
 0x263   : > { %1224 = vmatmul.mubr.msk.f32.gmra.mrb[12].mxu1 %vm488_vm2, %v586_v35 }
 0x264   : > { %750 = vmatprep.mubr.f32.mxu1 %v1461_v18 }
 0x266   : > { %v587_v36 = vpop.trf.xlu0 }
 0x267   : > { %1225 = vmatmul.mubr.msk.f32.gmra.mrb[14].mxu1 %vm488_vm2, %v587_v36 }
 0x268   : > { %756 = vmatprep.mubr.f32.mxu1 %v1461_v18 }
 0x26a   : > { %v588_v37 = vpop.trf.xlu0 }
 0x26b   : > { %1226 = vmatmul.mubr.msk.f32.gmra.mrb[16].mxu1 %vm488_vm2, %v588_v37 }
 0x26c   : > { %762 = vmatprep.mubr.f32.mxu1 %v1461_v18 }
 0x26e   : > { %v589_v38 = vpop.trf.xlu0 }
 0x26f   : > { %1227 = vmatmul.mubr.msk.f32.gmra.mrb[18].mxu1 %vm488_vm2, %v589_v38 }
 0x270   : > { %768 = vmatprep.mubr.f32.mxu1 %v1461_v18 }
 0x272   : > { %v590_v39 = vpop.trf.xlu0 }
 0x273   : > { %1228 = vmatmul.mubr.msk.f32.gmra.mrb[20].mxu1 %vm488_vm2, %v590_v39 }
 0x274   : > { %774 = vmatprep.mubr.f32.mxu1 %v1461_v18 }
 0x276   : > { %v591_v40 = vpop.trf.xlu0 }
 0x277   : > { %1229 = vmatmul.mubr.msk.f32.gmra.mrb[22].mxu1 %vm488_vm2, %v591_v40 }
 0x278   : > { %780 = vmatprep.mubr.f32.mxu1 %v1461_v18 }
 0x27a   : > { %v592_v41 = vpop.trf.xlu0 }
 0x27b   : > { %1230 = vmatmul.mubr.msk.f32.gmra.mrb[24].mxu1 %vm488_vm2, %v592_v41 }
 0x27c   : > { %786 = vmatprep.mubr.f32.mxu1 %v1461_v18 }
 0x27e   : > { %v593_v42 = vpop.trf.xlu0 }
 0x27f   : > { %1231 = vmatmul.mubr.msk.f32.gmra.mrb[26].mxu1 %vm488_vm2, %v593_v42 }
 0x280   : > { %792 = vmatprep.mubr.f32.mxu1 %v1461_v18 }
 0x282   : > { %v594_v43 = vpop.trf.xlu0 }
 0x283   : > { %1232 = vmatmul.mubr.msk.f32.gmra.mrb[28].mxu1 %vm488_vm2, %v594_v43 }
 0x284   : > { %798 = vmatprep.mubr.f32.mxu1 %v1461_v18 }
 0x286   : > { %v595_v44 = vpop.trf.xlu0 }
 0x287   : > { %1233 = vmatmul.mubr.msk.f32.gmra.mrb[30].mxu1 %vm488_vm2, %v595_v44 }
 0x31e   : > { %v1621_v45 = vpop.f32.mrb[0].mxu1 }
 0x31f   : > { %v1623_v46 = vpop.f32.mrb[1].mxu1 }
 0x320   : > { %v805_v47 = vmax.f32 %v1621_v45, %v1623_v46 }
 0x322   : > { %806 = vmax.xlane.f32.xlu1 %v805_v47  ;;  %v1627_v48 = vpop.f32.mrb[2].mxu1 }
 0x323   : > { %v1629_v49 = vpop.f32.mrb[3].mxu1 }
 0x324   : > { %v808_v50 = vmax.f32 %v1627_v48, %v1629_v49 }
 0x326   : > { %809 = vmax.xlane.f32.xlu1 %v808_v50  ;;  %v1633_v51 = vpop.f32.mrb[4].mxu1 }
 0x327   : > { %v1635_v52 = vpop.f32.mrb[5].mxu1 }
 0x328   : > { %v811_v53 = vmax.f32 %v1633_v51, %v1635_v52 }
 0x32a   : > { %812 = vmax.xlane.f32.xlu1 %v811_v53  ;;  %v1639_v54 = vpop.f32.mrb[6].mxu1 }
 0x32b   : > { %v1641_v55 = vpop.f32.mrb[7].mxu1 }
 0x32c   : > { %v814_v56 = vmax.f32 %v1639_v54, %v1641_v55 }
 0x32e   : > { %815 = vmax.xlane.f32.xlu1 %v814_v56  ;;  %v1645_v57 = vpop.f32.mrb[8].mxu1 }
 0x32f   : > { %v1647_v58 = vpop.f32.mrb[9].mxu1 }
 0x330   : > { %v817_v59 = vmax.f32 %v1645_v57, %v1647_v58 }
 0x332   : > { %818 = vmax.xlane.f32.xlu1 %v817_v59  ;;  %v1651_v60 = vpop.f32.mrb[10].mxu1 }
 0x333   : > { %v1653_v61 = vpop.f32.mrb[11].mxu1 }
 0x334   : > { %v820_v62 = vmax.f32 %v1651_v60, %v1653_v61 }
 0x336   : > { %821 = vmax.xlane.f32.xlu1 %v820_v62  ;;  %v1657_v63 = vpop.f32.mrb[12].mxu1 }
 0x337   : > { %v1659_v0 = vpop.f32.mrb[13].mxu1 }
 0x338   : > { %v823_v1 = vmax.f32 %v1657_v63, %v1659_v0 }
 0x33a   : > { %824 = vmax.xlane.f32.xlu1 %v823_v1  ;;  %v1663_v2 = vpop.f32.mrb[14].mxu1 }
 0x33b   : > { %v1665_v3 = vpop.f32.mrb[15].mxu1 }
 0x33c   : > { %v826_v4 = vmax.f32 %v1663_v2, %v1665_v3 }
 0x33e   : > { %827 = vmax.xlane.f32.xlu1 %v826_v4  ;;  %v1669_v5 = vpop.f32.mrb[16].mxu1 }
 0x33f   : > { %v1671_v6 = vpop.f32.mrb[17].mxu1 }
 0x340   : > { %v829_v7 = vmax.f32 %v1669_v5, %v1671_v6 }
 0x342   : > { %830 = vmax.xlane.f32.xlu1 %v829_v7  ;;  %v1675_v8 = vpop.f32.mrb[18].mxu1 }
 0x343   : > { %v1677_v9 = vpop.f32.mrb[19].mxu1 }
 0x344   : > { %v832_v10 = vmax.f32 %v1675_v8, %v1677_v9 }
 0x346   : > { %833 = vmax.xlane.f32.xlu0 %v832_v10  ;;  %v1681_v11 = vpop.f32.mrb[20].mxu1 }
 0x347   : > { %v1683_v12 = vpop.f32.mrb[21].mxu1 }
 0x348   : > { %v835_v13 = vmax.f32 %v1681_v11, %v1683_v12 }
 0x34a   : > { %836 = vmax.xlane.f32.xlu1 %v835_v13  ;;  %v1687_v14 = vpop.f32.mrb[22].mxu1 }
 0x34b   : > { %v1689_v15 = vpop.f32.mrb[23].mxu1 }
 0x34c   : > { %v838_v16 = vmax.f32 %v1687_v14, %v1689_v15 }
 0x34e   : > { %839 = vmax.xlane.f32.xlu1 %v838_v16  ;;  %v1693_v17 = vpop.f32.mrb[24].mxu1 }
 0x34f   : > { %v1695_v18 = vpop.f32.mrb[25].mxu1 }
 0x350   : > { %v841_v19 = vmax.f32 %v1693_v17, %v1695_v18 }
 0x352   : > { %842 = vmax.xlane.f32.xlu1 %v841_v19  ;;  %v1699_v20 = vpop.f32.mrb[26].mxu1 }
 0x353   : > { %v1701_v21 = vpop.f32.mrb[27].mxu1 }
 0x354   : > { %v844_v23 = vmax.f32 %v1699_v20, %v1701_v21 }
 0x356   : > { %845 = vmax.xlane.f32.xlu1 %v844_v23  ;;  %v1705_v24 = vpop.f32.mrb[28].mxu1 }
 0x357   : > { %v1707_v25 = vpop.f32.mrb[29].mxu1 }
 0x358   : > { %v847_v26 = vmax.f32 %v1705_v24, %v1707_v25 }
 0x35a   : > { %848 = vmax.xlane.f32.xlu1 %v847_v26  ;;  %v1711_v27 = vpop.f32.mrb[30].mxu1 }
 0x35b   : > { %v1713_v28 = vpop.f32.mrb[31].mxu1 }
 0x35c   : > { %v850_v29 = vmax.f32 %v1711_v27, %v1713_v28 }
 0x35e   : > { %851 = vmax.xlane.f32.xlu1 %v850_v29 }
 0x3af   : > { %v807_v30 = vpop.xlane.xlu1 %806 }
 0x3b0   : > { %v853_v31 = vsub.f32 %v1621_v45, %v807_v30  ;;  %v854_v32 = vsub.f32 %v1623_v46, %v807_v30 }
 0x3b2   : > { %v885_v33 = vmul.f32 1.442695, %v853_v31  ;;  %v887_v34 = vmul.f32 1.442695, %v854_v32 }
 0x3b3   : > { %v810_v35 = vpop.xlane.xlu1 %809 }
 0x3b4   : > { %1323 = vpow2.f32 %v885_v33  ;;  %v855_v36 = vsub.f32 %v1627_v48, %v810_v35  ;;  %v856_v37 = vsub.f32 %v1629_v49, %v810_v35 }
 0x3b5   : > { %1325 = vpow2.f32 %v887_v34 }
 0x3b6   : > { %v889_v38 = vmul.f32 1.442695, %v855_v36  ;;  %v891_v39 = vmul.f32 1.442695, %v856_v37 }
 0x3b7   : > { %v813_v40 = vpop.xlane.xlu1 %812 }
 0x3b8   : > { %1327 = vpow2.f32 %v889_v38  ;;  %v857_v41 = vsub.f32 %v1633_v51, %v813_v40  ;;  %v858_v42 = vsub.f32 %v1635_v52, %v813_v40 }
 0x3b9   : > { %1329 = vpow2.f32 %v891_v39 }
 0x3ba   : > { %v893_v43 = vmul.f32 1.442695, %v857_v41  ;;  %v895_v44 = vmul.f32 1.442695, %v858_v42 }
 0x3bb   : > { %v816_v45 = vpop.xlane.xlu1 %815 }
 0x3bc   : > { %1331 = vpow2.f32 %v893_v43  ;;  %v859_v46 = vsub.f32 %v1639_v54, %v816_v45  ;;  %v860_v47 = vsub.f32 %v1641_v55, %v816_v45 }
 0x3bd   : > { %1333 = vpow2.f32 %v895_v44 }
 0x3be   : > { %v1725_v48 = vpop.eup %1323  ;;  %v897_v49 = vmul.f32 1.442695, %v859_v46  ;;  %v899_v50 = vmul.f32 1.442695, %v860_v47 }
 0x3bf   : > { %v1727_v53 = vpop.eup %1325  ;;  %v819_v56 = vpop.xlane.xlu1 %818 }
 0x3c0   : > { %1335 = vpow2.f32 %v897_v49  ;;  %v861_v51 = vsub.f32 %v1645_v57, %v819_v56  ;;  %v862_v52 = vsub.f32 %v1647_v58, %v819_v56  ;;  %v949_v59 = vadd.f32 %v1727_v53, %v1725_v48 }
 0x3c1   : > { %1337 = vpow2.f32 %v899_v50 }
 0x3c2   : > { %v1733_v54 = vpop.eup %1327  ;;  %v901_v55 = vmul.f32 1.442695, %v861_v51  ;;  %v903_v62 = vmul.f32 1.442695, %v862_v52  ;;  %950 = vadd.xlane.f32.xlu1 %v949_v59 }
 0x3c3   : > { %v1735_v1 = vpop.eup %1329  ;;  %v822_v4 = vpop.xlane.xlu1 %821 }
 0x3c4   : > { %1339 = vpow2.f32 %v901_v55  ;;  %v863_v7 = vsub.f32 %v1651_v60, %v822_v4  ;;  %v864_v10 = vsub.f32 %v1653_v61, %v822_v4  ;;  %v952_v57 = vadd.f32 %v1735_v1, %v1733_v54 }
 0x3c5   : > { %1341 = vpow2.f32 %v903_v62 }
 0x3c6   : > { %v1741_v58 = vpop.eup %1331  ;;  %v905_v13 = vmul.f32 1.442695, %v863_v7  ;;  %v907_v16 = vmul.f32 1.442695, %v864_v10  ;;  %953 = vadd.xlane.f32.xlu1 %v952_v57 }
 0x3c7   : > { %v1743_v19 = vpop.eup %1333  ;;  %v825_v23 = vpop.xlane.xlu1 %824 }
 0x3c8   : > { %1343 = vpow2.f32 %v905_v13  ;;  %v865_v26 = vsub.f32 %v1657_v63, %v825_v23  ;;  %v866_v29 = vsub.f32 %v1659_v0, %v825_v23  ;;  %v955_v60 = vadd.f32 %v1743_v19, %v1741_v58 }
 0x3c9   : > { %1345 = vpow2.f32 %v907_v16 }
 0x3ca   : > { %v1749_v61 = vpop.eup %1335  ;;  %v909_v30 = vmul.f32 1.442695, %v865_v26  ;;  %v911_v31 = vmul.f32 1.442695, %v866_v29  ;;  %956 = vadd.xlane.f32.xlu1 %v955_v60 }
 0x3cb   : > { %v1751_v32 = vpop.eup %1337  ;;  %v828_v33 = vpop.xlane.xlu1 %827 }
 0x3cc   : > { %1347 = vpow2.f32 %v909_v30  ;;  %v867_v34 = vsub.f32 %v1663_v2, %v828_v33  ;;  %v868_v35 = vsub.f32 %v1665_v3, %v828_v33  ;;  %v958_v63 = vadd.f32 %v1751_v32, %v1749_v61 }
 0x3cd   : > { %1349 = vpow2.f32 %v911_v31 }
 0x3ce   : > { %v1757_v0 = vpop.eup %1339  ;;  %v913_v36 = vmul.f32 1.442695, %v867_v34  ;;  %v915_v37 = vmul.f32 1.442695, %v868_v35  ;;  %959 = vadd.xlane.f32.xlu1 %v958_v63 }
 0x3cf   : > { %v1759_v38 = vpop.eup %1341  ;;  %v831_v39 = vpop.xlane.xlu1 %830 }
 0x3d0   : > { %1351 = vpow2.f32 %v913_v36  ;;  %v869_v40 = vsub.f32 %v1669_v5, %v831_v39  ;;  %v870_v41 = vsub.f32 %v1671_v6, %v831_v39  ;;  %v961_v2 = vadd.f32 %v1759_v38, %v1757_v0 }
 0x3d1   : > { %1353 = vpow2.f32 %v915_v37 }
 0x3d2   : > { %v1765_v3 = vpop.eup %1343  ;;  %v917_v42 = vmul.f32 1.442695, %v869_v40  ;;  %v919_v43 = vmul.f32 1.442695, %v870_v41  ;;  %962 = vadd.xlane.f32.xlu1 %v961_v2 }
 0x3d3   : > { %v1767_v44 = vpop.eup %1345  ;;  %v834_v45 = vpop.xlane.xlu0 %833 }
 0x3d4   : > { %1355 = vpow2.f32 %v917_v42  ;;  %v871_v46 = vsub.f32 %v1675_v8, %v834_v45  ;;  %v872_v47 = vsub.f32 %v1677_v9, %v834_v45  ;;  %v964_v5 = vadd.f32 %v1767_v44, %v1765_v3 }
 0x3d5   : > { %1357 = vpow2.f32 %v919_v43 }
 0x3d6   : > { %v1773_v6 = vpop.eup %1347  ;;  %v921_v49 = vmul.f32 1.442695, %v871_v46  ;;  %v923_v50 = vmul.f32 1.442695, %v872_v47  ;;  %965 = vadd.xlane.f32.xlu1 %v964_v5 }
 0x3d7   : > { %v1775_v56 = vpop.eup %1349  ;;  %v837_v51 = vpop.xlane.xlu1 %836 }
 0x3d8   : > { %1359 = vpow2.f32 %v921_v49  ;;  %v873_v52 = vsub.f32 %v1681_v11, %v837_v51  ;;  %v874_v59 = vsub.f32 %v1683_v12, %v837_v51  ;;  %v967_v8 = vadd.f32 %v1775_v56, %v1773_v6 }
 0x3d9   : > { %1361 = vpow2.f32 %v923_v50 }
 0x3da   : > { %v1781_v9 = vpop.eup %1351  ;;  %v925_v55 = vmul.f32 1.442695, %v873_v52  ;;  %v927_v62 = vmul.f32 1.442695, %v874_v59  ;;  %968 = vadd.xlane.f32.xlu1 %v967_v8 }
 0x3db   : > { %v1783_v4 = vpop.eup %1353  ;;  %v840_v7 = vpop.xlane.xlu1 %839 }
 0x3dc   : > { %1363 = vpow2.f32 %v925_v55  ;;  %v875_v10 = vsub.f32 %v1687_v14, %v840_v7  ;;  %v876_v57 = vsub.f32 %v1689_v15, %v840_v7  ;;  %v970_v11 = vadd.f32 %v1783_v4, %v1781_v9 }
 0x3dd   : > { %1365 = vpow2.f32 %v927_v62 }
 0x3de   : > { %v1789_v12 = vpop.eup %1355  ;;  %v929_v13 = vmul.f32 1.442695, %v875_v10  ;;  %v931_v16 = vmul.f32 1.442695, %v876_v57  ;;  %971 = vadd.xlane.f32.xlu1 %v970_v11  ;;  %v1046_v11 = vld [vmem:[#allocation3 + $0x8] sm:$0xff] }
 0x3df   : > { %v1791_v23 = vpop.eup %1357  ;;  %v843_v26 = vpop.xlane.xlu1 %842  ;;  %1111 = vmatprep.mubr.f32.mxu0 %v1046_v11 }
 0x3e0   : > { %1367 = vpow2.f32 %v929_v13  ;;  %v877_v29 = vsub.f32 %v1693_v17, %v843_v26  ;;  %v878_v60 = vsub.f32 %v1695_v18, %v843_v26  ;;  %v973_v14 = vadd.f32 %v1791_v23, %v1789_v12 }
 0x3e1   : > { %1369 = vpow2.f32 %v931_v16 }
 0x3e2   : > { %v1797_v15 = vpop.eup %1359  ;;  %v933_v30 = vmul.f32 1.442695, %v877_v29  ;;  %v935_v31 = vmul.f32 1.442695, %v878_v60  ;;  %974 = vadd.xlane.f32.xlu1 %v973_v14 }
 0x3e3   : > { %v1799_v33 = vpop.eup %1361  ;;  %v846_v34 = vpop.xlane.xlu1 %845 }
 0x3e4   : > { %1371 = vpow2.f32 %v933_v30  ;;  %v879_v35 = vsub.f32 %v1699_v20, %v846_v34  ;;  %v880_v63 = vsub.f32 %v1701_v21, %v846_v34  ;;  %v976_v17 = vadd.f32 %v1799_v33, %v1797_v15 }
 0x3e5   : > { %1373 = vpow2.f32 %v935_v31 }
 0x3e6   : > { %v1805_v18 = vpop.eup %1363  ;;  %v937_v36 = vmul.f32 1.442695, %v879_v35  ;;  %v939_v37 = vmul.f32 1.442695, %v880_v63  ;;  %977 = vadd.xlane.f32.xlu1 %v976_v17 }
 0x3e7   : > { %v1807_v39 = vpop.eup %1365  ;;  %v849_v40 = vpop.xlane.xlu1 %848 }
 0x3e8   : > { %1375 = vpow2.f32 %v937_v36  ;;  %v881_v41 = vsub.f32 %v1705_v24, %v849_v40  ;;  %v882_v2 = vsub.f32 %v1707_v25, %v849_v40  ;;  %v979_v20 = vadd.f32 %v1807_v39, %v1805_v18 }
 0x3e9   : > { %1377 = vpow2.f32 %v939_v37 }
 0x3ea   : > { %v1813_v21 = vpop.eup %1367  ;;  %v941_v42 = vmul.f32 1.442695, %v881_v41  ;;  %v943_v43 = vmul.f32 1.442695, %v882_v2  ;;  %980 = vadd.xlane.f32.xlu1 %v979_v20 }
 0x3eb   : > { %v1815_v45 = vpop.eup %1369  ;;  %v852_v46 = vpop.xlane.xlu1 %851 }
 0x3ec   : > { %1379 = vpow2.f32 %v941_v42  ;;  %v883_v47 = vsub.f32 %v1711_v27, %v852_v46  ;;  %v884_v5 = vsub.f32 %v1713_v28, %v852_v46  ;;  %v982_v24 = vadd.f32 %v1815_v45, %v1813_v21 }
 0x3ed   : > { %1381 = vpow2.f32 %v943_v43 }
 0x3ee   : > { %v1821_v25 = vpop.eup %1371  ;;  %v945_v49 = vmul.f32 1.442695, %v883_v47  ;;  %v947_v50 = vmul.f32 1.442695, %v884_v5  ;;  %983 = vadd.xlane.f32.xlu1 %v982_v24 }
 0x3ef   : > { %v1823_v51 = vpop.eup %1373 }
 0x3f0   : > { %1383 = vpow2.f32 %v945_v49  ;;  %v985_v52 = vadd.f32 %v1823_v51, %v1821_v25 }
 0x3f1   : > { %1385 = vpow2.f32 %v947_v50 }
 0x3f2   : > { %v1827_v59 = vpop.eup %1375  ;;  %986 = vadd.xlane.f32.xlu1 %v985_v52 }
 0x3f3   : > { %v1829_v27 = vpop.eup %1377 }
 0x3f4   : > { %v988_v28 = vadd.f32 %v1829_v27, %v1827_v59 }
 0x3f6   : > { %v1833_v8 = vpop.eup %1379  ;;  %989 = vadd.xlane.f32.xlu1 %v988_v28 }
 0x3f7   : > { %v1835_v55 = vpop.eup %1381 }
 0x3f8   : > { %v991_v62 = vadd.f32 %v1835_v55, %v1833_v8 }
 0x3fa   : > { %v1839_v7 = vpop.eup %1383  ;;  %992 = vadd.xlane.f32.xlu1 %v991_v62 }
 0x3fb   : > { %v1841_v10 = vpop.eup %1385 }
 0x3fc   : > { %v994_v57 = vadd.f32 %v1841_v10, %v1839_v7 }
 0x3fe   : > { %995 = vadd.xlane.f32.xlu1 %v994_v57 }
 0x44f   : > { %v951_v13 = vpop.xlane.xlu1 %950 }
 0x450   : > { %1387 = vrcp.f32 %v951_v13 }
 0x453   : > { %v954_v16 = vpop.xlane.xlu1 %953 }
 0x454   : > { %1389 = vrcp.f32 %v954_v16 }
 0x457   : > { %v957_v26 = vpop.xlane.xlu1 %956 }
 0x458   : > { %1391 = vrcp.f32 %v957_v26 }
 0x45a   : > { %v1388_v60 = vpop.eup %1387 }
 0x45b   : > { %v960_v29 = vpop.xlane.xlu1 %959  ;;  %v1014_v31 = vmul.f32 %v1388_v60, %v1727_v53  ;;  %v1013_v35 = vmul.f32 %v1388_v60, %v1725_v48 }
 0x45c   : > { %1393 = vrcp.f32 %v960_v29 }
 0x45e   : > { %v1390_v14 = vpop.eup %1389 }
 0x45f   : > { %v963_v30 = vpop.xlane.xlu1 %962  ;;  %v1016_v34 = vmul.f32 %v1390_v14, %v1735_v1  ;;  %v1015_v63 = vmul.f32 %v1390_v14, %v1733_v54 }
 0x460   : > { %1395 = vrcp.f32 %v963_v30 }
 0x461   : > { %v1244_v17 = vpack.c.bf16 %v1016_v34, %v1014_v31  ;;  %v1246_v36 = vpack.c.bf16 %v1015_v63, %v1013_v35 }
 0x462   : > { %v1392_v40 = vpop.eup %1391 }
 0x463   : > { %1245 = vmatprep.subr.bf16.mxu0 %v1244_v17  ;;  %v966_v37 = vpop.xlane.xlu1 %965  ;;  %v1018_v20 = vmul.f32 %v1392_v40, %v1743_v19  ;;  %v1017_v1 = vmul.f32 %v1392_v40, %v1741_v58 }
 0x464   : > { %1397 = vrcp.f32 %v966_v37  ;;  %1247 = vmatpush1.bf16.xpose.msra.mxu0 %v1246_v36 }
 0x466   : > { %v1394_v41 = vpop.eup %1393 }
 0x467   : > { %v969_v2 = vpop.xlane.xlu1 %968  ;;  %v1020_v53 = vmul.f32 %v1394_v41, %v1751_v32  ;;  %v1019_v48 = vmul.f32 %v1394_v41, %v1749_v61 }
 0x468   : > { %1399 = vrcp.f32 %v969_v2 }
 0x469   : > { %v1248_v42 = vpack.c.bf16 %v1020_v53, %v1018_v20  ;;  %v1250_v54 = vpack.c.bf16 %v1019_v48, %v1017_v1 }
 0x46a   : > { %v1396_v46 = vpop.eup %1395 }
 0x46b   : > { %1249 = vmatprep.subr.bf16.mxu0 %v1248_v42  ;;  %v972_v43 = vpop.xlane.xlu1 %971  ;;  %v1022_v24 = vmul.f32 %v1396_v46, %v1759_v38  ;;  %v1021_v32 = vmul.f32 %v1396_v46, %v1757_v0 }
 0x46c   : > { %1401 = vrcp.f32 %v972_v43  ;;  %1251 = vmatpush1.bf16.xpose.msra.mxu0 %v1250_v54  ;;  %v1117_v54 = vstv %s1546_s14 }
 0x46e   : > { %v1398_v47 = vpop.eup %1397 }
 0x46f   : > { %v975_v5 = vpop.xlane.xlu1 %974  ;;  %v1024_v19 = vmul.f32 %v1398_v47, %v1767_v44  ;;  %v1023_v58 = vmul.f32 %v1398_v47, %v1765_v3 }
 0x470   : > { %1403 = vrcp.f32 %v975_v5 }
 0x471   : > { %v1252_v49 = vpack.c.bf16 %v1024_v19, %v1022_v24  ;;  %v1254_v61 = vpack.c.bf16 %v1023_v58, %v1021_v32 }
 0x472   : > { %v1400_v52 = vpop.eup %1399 }
 0x473   : > { %1253 = vmatprep.subr.bf16.mxu0 %v1252_v49  ;;  %v978_v50 = vpop.xlane.xlu1 %977  ;;  %v1026_v57 = vmul.f32 %v1400_v52, %v1775_v56  ;;  %v1025_v44 = vmul.f32 %v1400_v52, %v1773_v6 }
 0x474   : > { %1405 = vrcp.f32 %v978_v50  ;;  %1255 = vmatpush1.bf16.xpose.msra.mxu0 %v1254_v61 }
 0x476   : > { %v1402_v28 = vpop.eup %1401 }
 0x477   : > { %v981_v62 = vpop.xlane.xlu1 %980  ;;  %v1028_v38 = vmul.f32 %v1402_v28, %v1783_v4  ;;  %v1027_v0 = vmul.f32 %v1402_v28, %v1781_v9 }
 0x478   : > { %1407 = vrcp.f32 %v981_v62 }
 0x479   : > { %v1256_v11 = vpack.c.bf16 %v1028_v38, %v1026_v57  ;;  %v1258_v3 = vpack.c.bf16 %v1027_v0, %v1025_v44 }
 0x47a   : > { %v1404_v16 = vpop.eup %1403 }
 0x47b   : > { %1257 = vmatprep.subr.bf16.mxu0 %v1256_v11  ;;  %v984_v13 = vpop.xlane.xlu1 %983  ;;  %v1030_v60 = vmul.f32 %v1404_v16, %v1791_v23  ;;  %v1029_v4 = vmul.f32 %v1404_v16, %v1789_v12 }
 0x47c   : > { %1409 = vrcp.f32 %v984_v13  ;;  %1259 = vmatpush1.bf16.xpose.msra.mxu0 %v1258_v3 }
 0x47e   : > { %v1406_v26 = vpop.eup %1405 }
 0x47f   : > { %v987_v29 = vpop.xlane.xlu1 %986  ;;  %v1032_v56 = vmul.f32 %v1406_v26, %v1799_v33  ;;  %v1031_v6 = vmul.f32 %v1406_v26, %v1797_v15 }
 0x480   : > { %1411 = vrcp.f32 %v987_v29 }
 0x481   : > { %v1260_v14 = vpack.c.bf16 %v1032_v56, %v1030_v60  ;;  %v1262_v9 = vpack.c.bf16 %v1031_v6, %v1029_v4 }
 0x482   : > { %v1408_v31 = vpop.eup %1407 }
 0x483   : > { %1261 = vmatprep.subr.bf16.mxu0 %v1260_v14  ;;  %v990_v30 = vpop.xlane.xlu1 %989  ;;  %v1034_v63 = vmul.f32 %v1408_v31, %v1807_v39  ;;  %v1033_v33 = vmul.f32 %v1408_v31, %v1805_v18 }
 0x484   : > { %1413 = vrcp.f32 %v990_v30  ;;  %1263 = vmatpush1.bf16.xpose.msra.mxu0 %v1262_v9 }
 0x486   : > { %v1410_v34 = vpop.eup %1409 }
 0x487   : > { %v993_v35 = vpop.xlane.xlu1 %992  ;;  %v1036_v23 = vmul.f32 %v1410_v34, %v1815_v45  ;;  %v1035_v12 = vmul.f32 %v1410_v34, %v1813_v21 }
 0x488   : > { %1415 = vrcp.f32 %v993_v35 }
 0x489   : > { %v1264_v17 = vpack.c.bf16 %v1036_v23, %v1034_v63  ;;  %v1266_v15 = vpack.c.bf16 %v1035_v12, %v1033_v33 }
 0x48a   : > { %v1412_v37 = vpop.eup %1411 }
 0x48b   : > { %1265 = vmatprep.subr.bf16.mxu0 %v1264_v17  ;;  %v996_v36 = vpop.xlane.xlu1 %995  ;;  %v1038_v41 = vmul.f32 %v1412_v37, %v1823_v51  ;;  %v1037_v39 = vmul.f32 %v1412_v37, %v1821_v25 }
 0x48c   : > { %1417 = vrcp.f32 %v996_v36  ;;  %1267 = vmatpush1.bf16.xpose.msra.mxu0 %v1266_v15 }
 0x48e   : > { %v1414_v40 = vpop.eup %1413 }
 0x48f   : > { %v1040_v2 = vmul.f32 %v1414_v40, %v1829_v27  ;;  %v1039_v45 = vmul.f32 %v1414_v40, %v1827_v59  ;;  %v1045_v59 = vld [vmem:[#allocation3] sm:$0xff] }
 0x491   : > { %v1268_v18 = vpack.c.bf16 %v1040_v2, %v1038_v41  ;;  %v1270_v21 = vpack.c.bf16 %v1039_v45, %v1037_v39 }
 0x492   : > { %v1416_v20 = vpop.eup %1415 }
 0x493   : > { %1269 = vmatprep.subr.bf16.mxu0 %v1268_v18  ;;  %v1042_v1 = vmul.f32 %v1416_v20, %v1835_v55  ;;  %v1041_v51 = vmul.f32 %v1416_v20, %v1833_v8 }
 0x494   : > { %1271 = vmatpush1.bf16.xpose.msra.mxu0 %v1270_v21 }
 0x496   : > { %v1418_v53 = vpop.eup %1417 }
 0x497   : > { %v1044_v48 = vmul.f32 %v1418_v53, %v1841_v10  ;;  %v1043_v27 = vmul.f32 %v1418_v53, %v1839_v7 }
 0x499   : > { %v1272_v42 = vpack.c.bf16 %v1044_v48, %v1042_v1  ;;  %v1274_v25 = vpack.c.bf16 %v1043_v27, %v1041_v51 }
 0x49b   : > { %1273 = vmatprep.subr.bf16.mxu0 %v1272_v42 }
 0x49c   : > { %1275 = vmatpush1.bf16.xpose.msra.mxu0 %v1274_v25 }
 0x4a3   : > { %1112 = vmatmul.mubr.f32.vlgmr.msra.gmra.mrb[2].mxu0 %v1045_v59 }
 0x576   : > { %v1113_v43 = vpop.f32.mrb[2].mxu0 }
 0x577   : > { %v1118_v46 = vmul.f32 %v1117_v54, %v1113_v43  ;;  %v1115_v47 = vpop.f32.mrb[3].mxu0 }
 0x579   : > { %v1119_v5 = vadd.f32 %v1118_v46, %v1586_v22 }
 0x57b   : > { %1120 = vst [vmem:[%s1557_s25] sm:$0xff] %v1119_v5 }
 0x57c PF: > { %s19_s11 = sadd.s32 1, %s1457_s11   ;;  %s1904_s29 = smov %s1449_s9 }
 0x57d   : > { %p16_p8 = scmp.ge.s32.totalorder %s19_s11, 6   ;;  %s1905_s30 = smov %s1453_s10 }
 0x57e   : > { %s1906_s9 = smov %s1909_s0  ;;  %s1907_s10 = smov %s1913_s12 }
 0x57f   :  { %18 = sbr.rel (!%p16_p8) target bundleno = 3 (0x3), region = 83 }

</bundles_post_ra>
